<compile_context>
chip_gen: v7x
topology: tpu7x:2x2x1
jax: 0.10.0
libtpu: 0.0.40
codegen_flags: <defaults>
</compile_context>

<pallas_src>
import functools

import jax
import jax.numpy as jnp
from jax import lax
from jax.experimental import pallas as pl
from jax.experimental.pallas import tpu as pltpu


def _round_up(x, m):
    return ((x + m - 1) // m) * m


def _vmem_capacity_bytes():
    try:
        return int(pltpu.get_tpu_info().vmem_capacity_bytes)
    except Exception:
        return 64 * 1024 * 1024            # conservative: v7x per-core VMEM


def _auto_t_tile(T, F, H, vmem_budget):
    # frames tile (f32, double-buffered) + per-row in-kernel temporaries
    per_row = 2 * F * 4 + (2 * F + 16 * H + 1024)
    # resident bf16 weights (default double-buffered) + fixed headroom
    weights = 4 * H * (F + H + 128) + (64 << 10)
    fixed = 2 << 20
    rows = (vmem_budget - weights - fixed) // max(per_row, 1)
    rows = (rows // 8) * 8
    return int(max(8, min(rows, 2048, _round_up(T, 8))))


# ---------------------------------------------------------------------------
# Fused kernel, grid = (batch, time_split, time_tile):
#   h   = gelu(frames @ Wf + bf)                      (tT, H)  feature stand-in
#   z   = tanh(h @ W1 + b1)                           (tT, H)
#   s   = (z @ W2_pad)[:, 0] + b2                     (tT, 1)  MXU, lane 0
#   online softmax over the time tiles of this split (m, l, acc in VMEM
#   scratch); the per-split partials are merged + divided in a JAX epilogue.
# ---------------------------------------------------------------------------
def fused_wavlm_attnpool_kernel(
    frames_ref,   # (1, tT, F)  VMEM f32  raw-audio frames tile
    wf_ref,       # (F, H)      VMEM bf16 stand-in feature projection weight
    bf_ref,       # (1, H)      VMEM f32  stand-in feature projection bias
    w1_ref,       # (H, H)      VMEM bf16 AttentionLayer linear1 weight (x @ W)
    b1_ref,       # (1, H)      VMEM f32  AttentionLayer linear1 bias
    w2_ref,       # (H, 128)    VMEM bf16 AttentionLayer linear2 weight (lane 0)
    b2_ref,       # (1,)        SMEM f32  AttentionLayer linear2 bias (scalar)
    m_out_ref,    # (1,1,1,1)   VMEM f32  partial softmax max   for (b, split)
    l_out_ref,    # (1,1,1,1)   VMEM f32  partial softmax denom for (b, split)
    acc_out_ref,  # (1,1,1,H)   VMEM f32  partial weighted sum  for (b, split)
    m_sc,         # (1, 1)      VMEM scratch: running max
    l_sc,         # (1, 1)      VMEM scratch: running denominator
    acc_sc,       # (1, H)      VMEM scratch: running weighted sum
    *,
    t_valid,          # static: number of valid (un-padded) frames
    t_tile,           # static: rows per time tile
    tiles_per_split,  # static: time tiles handled by one split
    need_mask,        # static: any padded / out-of-range rows exist
    ew_dtype,         # static: dtype for GELU/tanh (bf16 on v6e/v7x, f32 on v5e)
):
    c = pl.program_id(1)
    t = pl.program_id(2)
    gt = c * tiles_per_split + t          # global time-tile index

    @pl.when(t == 0)
    def _():
        m_sc[...] = jnp.full_like(m_sc, -jnp.inf)
        l_sc[...] = jnp.zeros_like(l_sc)
        acc_sc[...] = jnp.zeros_like(acc_sc)

    # MXU operands in bf16 (native on all generations); accumulate in f32.
    x = frames_ref[0].astype(jnp.bfloat16)                       # (tT, F)

    if need_mask:
        # Rows >= t_valid come from the unspecified tail of a partial block:
        # zero them in x (so h stays finite; 0*NaN would poison acc) and push
        # their scores to -inf.  Only the tiles that actually contain padded
        # rows pay for the iota + selects (lax.cond).
        def _masked(xin):
            row = lax.broadcasted_iota(jnp.int32, (t_tile, 1), 0) + gt * t_tile
            valid = row < t_valid
            xm = jnp.where(valid, xin, jnp.zeros_like(xin))
            sb = jnp.where(valid, jnp.float32(0.0), jnp.float32(-jnp.inf))
            return xm, sb

        def _passthrough(xin):
            return xin, jnp.zeros((t_tile, 1), jnp.float32)

        x, s_bias = lax.cond((gt + 1) * t_tile > t_valid,
                             _masked, _passthrough, x)
    else:
        s_bias = None

    # --- WavLM stand-in: framed linear projection + GELU --------------------
    # TODO(synk): the pretrained WavLM transformer encoder is not reproducible
    # in-script; this deterministic framed projection + GELU stands in for it.
    h32 = jnp.dot(x, wf_ref[...], preferred_element_type=jnp.float32) + bf_ref[...]
    h = jax.nn.gelu(h32.astype(ew_dtype))                        # (tT, H)

    # --- AttentionLayer scores: Linear(H,H) -> Tanh -> Linear(H,1) ----------
    z32 = (jnp.dot(h.astype(jnp.bfloat16), w1_ref[...],
                   preferred_element_type=jnp.float32) + b1_ref[...])
    z = jnp.tanh(z32.astype(ew_dtype))                           # (tT, H)
    # (H,1) projection on the MXU: W2 zero-padded to (H,128), take lane 0.
    s128 = jnp.dot(z.astype(jnp.bfloat16), w2_ref[...],
                   preferred_element_type=jnp.float32)           # (tT, 128)
    s = s128[:, :1] + b2_ref[0]                                  # (tT, 1)
    if s_bias is not None:
        s = s + s_bias

    # --- online softmax accumulation over this split's time tiles -----------
    m_prev = m_sc[...]                                           # (1, 1)
    m_new = jnp.maximum(m_prev, jnp.max(s, axis=0, keepdims=True))
    corr = jnp.exp(m_prev - m_new)                               # (1, 1)
    p = jnp.exp(s - m_new)                                       # (tT, 1)
    l_sc[...] = corr * l_sc[...] + jnp.sum(p, axis=0, keepdims=True)
    # p.h reduction stays on the VPU (~200 VALU cycles/tile, hidden under MXU).
    acc_sc[...] = corr * acc_sc[...] + jnp.sum(p * h, axis=0, keepdims=True)
    m_sc[...] = m_new

    @pl.when(t == pl.num_programs(2) - 1)
    def _():
        m_out_ref[0, 0] = m_sc[...]
        l_out_ref[0, 0] = l_sc[...]
        acc_out_ref[0, 0] = acc_sc[...].astype(acc_out_ref.dtype)


# ---------------------------------------------------------------------------
# Wrapper
# ---------------------------------------------------------------------------
def custom_wavlm_forward(input_values, params, *, t_tile=None, time_splits=None,
                         elementwise_dtype=jnp.bfloat16, vmem_limit_bytes=None):
    """Forward pass of CustomWavLMForFeatureExtraction (stand-in feature path).

    elementwise_dtype: bf16 uses the bf16 VPU/EUP of v6e/v7x for GELU/tanh;
      pass jnp.float32 on v5e (no bf16 VPU/EUP, the casts would only add work).
    time_splits: 1 or 2. 2 splits the time axis over two "parallel" grid slices
      (v7x megacore when batch==1); partials are merged in a tiny JAX epilogue.
    """
    frame_len = int(params["frame_len"])
    B, L = input_values.shape
    T = L // frame_len
    assert T >= 1, "waveform shorter than one frame"
    F = frame_len
    H = params["wf"].shape[1]

    # No host-side padding of the waveform: trailing samples that do not fill a
    # full frame are dropped, and partial time tiles are masked in-kernel
    # (saves a full extra HBM read+write of the frames before the kernel).
    frames = input_values[:, :T * F].reshape(B, T, F)

    vmem_cap = _vmem_capacity_bytes()
    if vmem_limit_bytes is None:
        vmem_limit_bytes = min(int(0.55 * vmem_cap), 100 * 1024 * 1024)
    if t_tile is None:
        t_tile = _auto_t_tile(T, F, H, vmem_limit_bytes)
    t_tile = max(8, _round_up(min(int(t_tile), _round_up(T, 8)), 8))

    n_t = int(pl.cdiv(T, t_tile))
    if time_splits is None:
        time_splits = 2 if (B == 1 and n_t >= 2) else 1
    time_splits = int(max(1, min(int(time_splits), 2, n_t)))
    tps = int(pl.cdiv(n_t, time_splits))
    # every split's first tile must contain at least one valid frame
    # (guarantees the online-softmax running max is finite before any
    #  fully-masked tile is folded in).
    assert all(c * tps * t_tile < T for c in range(time_splits))

    need_mask = (time_splits * tps * t_tile) > T
    last_block = n_t - 1

    # MXU operands in bf16; biases and accumulators stay f32.
    wf = params["wf"].astype(jnp.bfloat16)
    bf = params["bf"].reshape(1, H).astype(jnp.float32)
    w1 = params["w1"].astype(jnp.bfloat16)
    b1 = params["b1"].reshape(1, H).astype(jnp.float32)
    w2p = jnp.pad(params["w2"].astype(jnp.float32),
                  ((0, 0), (0, 127))).astype(jnp.bfloat16)       # (H, 128)
    b2 = params["b2"].reshape(1).astype(jnp.float32)

    kernel = functools.partial(
        fused_wavlm_attnpool_kernel,
        t_valid=T, t_tile=t_tile, tiles_per_split=tps,
        need_mask=need_mask, ew_dtype=elementwise_dtype)

    m_p, l_p, acc_p = pl.pallas_call(
        kernel,
        out_shape=(
            jax.ShapeDtypeStruct((B, time_splits, 1, 1), jnp.float32),
            jax.ShapeDtypeStruct((B, time_splits, 1, 1), jnp.float32),
            jax.ShapeDtypeStruct((B, time_splits, 1, H), jnp.float32),
        ),
        grid=(B, time_splits, tps),
        in_specs=[
            # Out-of-range tiles of the last split are clamped to the last
            # valid block; their rows are fully masked inside the kernel.
            pl.BlockSpec((1, t_tile, F),
                         lambda b, c, t: (b, jnp.minimum(c * tps + t, last_block), 0)),
            # Constant-index weight blocks: Pallas DMAs them only once.
            pl.BlockSpec((F, H), lambda b, c, t: (0, 0)),
            pl.BlockSpec((1, H), lambda b, c, t: (0, 0)),
            pl.BlockSpec((H, H), lambda b, c, t: (0, 0)),
            pl.BlockSpec((1, H), lambda b, c, t: (0, 0)),
            pl.BlockSpec((H, 128), lambda b, c, t: (0, 0)),
            pl.BlockSpec(memory_space=pltpu.MemorySpace.SMEM),   # scalar b2
        ],
        out_specs=(
            pl.BlockSpec((1, 1, 1, 1), lambda b, c, t: (b, c, 0, 0)),
            pl.BlockSpec((1, 1, 1, 1), lambda b, c, t: (b, c, 0, 0)),
            pl.BlockSpec((1, 1, 1, H), lambda b, c, t: (b, c, 0, 0)),
        ),
        scratch_shapes=[
            pltpu.VMEM((1, 1), jnp.float32),   # running max
            pltpu.VMEM((1, 1), jnp.float32),   # running denom
            pltpu.VMEM((1, H), jnp.float32),   # running weighted sum
        ],
        compiler_params=pltpu.CompilerParams(
            dimension_semantics=("parallel", "parallel", "arbitrary"),
            vmem_limit_bytes=int(vmem_limit_bytes),
        ),
    )(frames, wf, bf, w1, b1, w2p, b2)

    # Tiny JAX epilogue: merge per-split partial softmax stats (flash-style)
    # and perform the exact (non-approximate) division once per batch element.
    m = m_p[:, :, 0, 0]                                   # (B, C)
    l = l_p[:, :, 0, 0]                                   # (B, C)
    acc = acc_p[:, :, 0, :]                               # (B, C, H)
    m_star = jnp.max(m, axis=1, keepdims=True)            # (B, 1)
    w = jnp.exp(m - m_star)                                # (B, C)
    denom = jnp.sum(w * l, axis=1, keepdims=True)          # (B, 1)
    num = jnp.sum(w[:, :, None] * acc, axis=1)             # (B, H)
    return num / denom                                     # (B, H)


# ---------------------------------------------------------------------------
# Pure-JAX reference (mirrors the PyTorch AttentionLayer semantics + the same
# stand-in feature extractor), f32 end-to-end.
# ---------------------------------------------------------------------------
def reference_forward(input_values, params):
    F = params["frame_len"]
    B, L = input_values.shape
    T = L // F
    frames = input_values[:, :T * F].reshape(B, T, F)
    h = jax.nn.gelu(frames @ params["wf"] + params["bf"])          # (B,T,H)
    z = jnp.tanh(h @ params["w1"] + params["b1"])                  # (B,T,H)
    s = (z @ params["w2"] + params["b2"])[..., 0]                  # (B,T)
    a = jax.nn.softmax(s, axis=-1)                                 # (B,T)
    return jnp.sum(h * a[..., None], axis=1)                       # (B,H)


if __name__ == "__main__":
    B, T, F, H = 2, 28, 16, 32
    L = T * F

    key = jax.random.PRNGKey(0)
    k_x, k_wf, k_bf, k_w1, k_b1, k_w2, k_b2, k_x2 = jax.random.split(key, 8)

    params = {
        "frame_len": F,
        # stand-in WavLM feature projection
        "wf": 0.05 * jax.random.normal(k_wf, (F, H), dtype=jnp.float32),
        "bf": 0.05 * jax.random.normal(k_bf, (1, H), dtype=jnp.float32),
        # AttentionLayer: Linear(H,H) -> Tanh -> Linear(H,1)
        # (stored transposed so kernels compute x @ W + b, matching
        #  x @ W.T + b of torch.nn.Linear with weight shape (out, in))
        "w1": 0.05 * jax.random.normal(k_w1, (H, H), dtype=jnp.float32),
        "b1": 0.05 * jax.random.normal(k_b1, (1, H), dtype=jnp.float32),
        "w2": 0.05 * jax.random.normal(k_w2, (H, 1), dtype=jnp.float32),
        "b2": 0.05 * jax.random.normal(k_b2, (1, 1), dtype=jnp.float32),
    }

    tol = dict(atol=2e-2, rtol=2e-2)   # headroom for the bf16 MXU/elementwise path

    # Case 1: B=2, explicit small t_tile -> 4 time tiles, last one partial.
    x1 = jax.random.normal(k_x, (B, L), dtype=jnp.float32)
    out1 = jax.block_until_ready(custom_wavlm_forward(x1, params, t_tile=8))
    ref1 = reference_forward(x1, params)
    assert out1.shape == (B, H), out1.shape
    assert jnp.allclose(out1, ref1, **tol), float(jnp.max(jnp.abs(out1 - ref1)))

    # Case 2: B=1, time axis split over two "parallel" slices (v7x megacore
    # path), odd tile count -> one fully-masked out-of-range tile, and the
    # f32 elementwise (v5e-friendly) path.
    T2 = 20
    x2 = jax.random.normal(k_x2, (1, T2 * F), dtype=jnp.float32)
    out2 = jax.block_until_ready(
        custom_wavlm_forward(x2, params, t_tile=8, time_splits=2,
                             elementwise_dtype=jnp.float32))
    ref2 = reference_forward(x2, params)
    assert out2.shape == (1, H), out2.shape
    assert jnp.allclose(out2, ref2, **tol), float(jnp.max(jnp.abs(out2 - ref2)))

    # Case 3: exact tiling (no masking code path compiled in).
    x3 = x1[:, : 16 * F]
    out3 = jax.block_until_ready(custom_wavlm_forward(x3, params, t_tile=8))
    ref3 = reference_forward(x3, params)
    assert jnp.allclose(out3, ref3, **tol), float(jnp.max(jnp.abs(out3 - ref3)))

    # Case 4: fully automatic (VMEM-derived) tiling / split selection.
    out4 = jax.block_until_ready(custom_wavlm_forward(x1, params))
    assert jnp.allclose(out4, ref1, **tol), float(jnp.max(jnp.abs(out4 - ref1)))

    print("KERNEL_OK")
</pallas_src>

<mosaic_0001>
module attributes {stable_mosaic.version = 11 : i64} {
  func.func @fused_wavlm_attnpool_kernel(%arg0: i32, %arg1: i32, %arg2: i32, %arg3: memref<1x8x16xf32, #tpu.memory_space<vmem>>, %arg4: memref<16x32xbf16, #tpu.memory_space<vmem>>, %arg5: memref<1x32xf32, #tpu.memory_space<vmem>>, %arg6: memref<32x32xbf16, #tpu.memory_space<vmem>>, %arg7: memref<1x32xf32, #tpu.memory_space<vmem>>, %arg8: memref<32x128xbf16, #tpu.memory_space<vmem>>, %arg9: memref<1xf32, #tpu.memory_space<smem>>, %arg10: memref<1x1x1x1xf32, #tpu.memory_space<vmem>>, %arg11: memref<1x1x1x1xf32, #tpu.memory_space<vmem>>, %arg12: memref<1x1x1x32xf32, #tpu.memory_space<vmem>>, %arg13: memref<1x1xf32, #tpu.memory_space<vmem>>, %arg14: memref<1x1xf32, #tpu.memory_space<vmem>>, %arg15: memref<1x32xf32, #tpu.memory_space<vmem>>) attributes {dimension_semantics = [#tpu.dimension_semantics<parallel>, #tpu.dimension_semantics<parallel>, #tpu.dimension_semantics<arbitrary>], iteration_bounds = array<i64: 2, 1, 4>, scalar_prefetch = 0 : i64, scratch_operands = 3 : i64, tpu.core_type = #tpu.core_type<tc>, window_params = [{transform_indices = @transform_0, window_bounds = array<i64: 1, 8, 16>}, {pipeline_mode = #tpu.pipeline_mode<synchronous>, transform_indices = @transform_1, window_bounds = array<i64: 16, 32>}, {pipeline_mode = #tpu.pipeline_mode<synchronous>, transform_indices = @transform_2, window_bounds = array<i64: 1, 32>}, {pipeline_mode = #tpu.pipeline_mode<synchronous>, transform_indices = @transform_3, window_bounds = array<i64: 32, 32>}, {pipeline_mode = #tpu.pipeline_mode<synchronous>, transform_indices = @transform_4, window_bounds = array<i64: 1, 32>}, {pipeline_mode = #tpu.pipeline_mode<synchronous>, transform_indices = @transform_5, window_bounds = array<i64: 32, 128>}, {transform_indices = @transform_6, window_bounds = array<i64: 1>}, {transform_indices = @transform_7, window_bounds = array<i64: 1, 1, 1, 1>}, {transform_indices = @transform_8, window_bounds = array<i64: 1, 1, 1, 1>}, {transform_indices = @transform_9, window_bounds = array<i64: 1, 1, 1, 32>}]} {
    %c4_i32 = arith.constant 4 : i32
    %0 = arith.muli %arg1, %c4_i32 : i32
    %1 = arith.addi %0, %arg2 : i32
    %c0_i32 = arith.constant 0 : i32
    %2 = arith.cmpi eq, %arg2, %c0_i32 : i32
    %3 = arith.extui %2 : i1 to i32
    %c0_i32_0 = arith.constant 0 : i32
    %4 = arith.cmpi ne, %3, %c0_i32_0 : i32
    scf.if %4 {
      %cst_37 = arith.constant 0xFF800000 : f32
      %76 = vector.broadcast %cst_37 : f32 to vector<1x1xf32>
      %c0_38 = arith.constant 0 : index
      %c0_39 = arith.constant 0 : index
      %77 = vector.load %arg13[%c0_38, %c0_39] : memref<1x1xf32, #tpu.memory_space<vmem>>, vector<1x1xf32>
      tpu.vector_store %arg13[%c0_38, %c0_39], %76 {strides = array<i32>} : memref<1x1xf32, #tpu.memory_space<vmem>>, vector<1x1xf32>,
      %cst_40 = arith.constant 0.000000e+00 : f32
      %78 = vector.broadcast %cst_40 : f32 to vector<1x1xf32>
      %c0_41 = arith.constant 0 : index
      %c0_42 = arith.constant 0 : index
      %79 = vector.load %arg14[%c0_41, %c0_42] : memref<1x1xf32, #tpu.memory_space<vmem>>, vector<1x1xf32>
      tpu.vector_store %arg14[%c0_41, %c0_42], %78 {strides = array<i32>} : memref<1x1xf32, #tpu.memory_space<vmem>>, vector<1x1xf32>,
      %cst_43 = arith.constant 0.000000e+00 : f32
      %80 = vector.broadcast %cst_43 : f32 to vector<1x32xf32>
      %c0_44 = arith.constant 0 : index
      %c0_45 = arith.constant 0 : index
      %81 = vector.load %arg15[%c0_44, %c0_45] : memref<1x32xf32, #tpu.memory_space<vmem>>, vector<1x32xf32>
      tpu.vector_store %arg15[%c0_44, %c0_45], %80 {strides = array<i32>} : memref<1x32xf32, #tpu.memory_space<vmem>>, vector<1x32xf32>,
    } else {
    }
    %c0 = arith.constant 0 : index
    %c0_1 = arith.constant 0 : index
    %c0_2 = arith.constant 0 : index
    %5 = vector.load %arg3[%c0, %c0_1, %c0_2] : memref<1x8x16xf32, #tpu.memory_space<vmem>>, vector<1x8x16xf32>
    %6 = vector.shape_cast %5 : vector<1x8x16xf32> to vector<8x16xf32>
    %7 = arith.truncf %6 : vector<8x16xf32> to vector<8x16xbf16>
    %c1_i32 = arith.constant 1 : i32
    %8 = arith.addi %1, %c1_i32 : i32
    %c8_i32 = arith.constant 8 : i32
    %9 = arith.muli %8, %c8_i32 : i32
    %c28_i32 = arith.constant 28 : i32
    %10 = arith.cmpi sgt, %9, %c28_i32 : i32
    %11 = arith.extui %10 : i1 to i32
    %c0_i32_3 = arith.constant 0 : i32
    %12 = arith.cmpi ne, %11, %c0_i32_3 : i32
    %13:2 = scf.if %12 -> (vector<8x16xbf16>, vector<8x1xf32>) {
      %76 = tpu.iota {dimensions = array<i32: 0>} : vector<8x1xi32>
      %c8_i32_37 = arith.constant 8 : i32
      %77 = arith.muli %1, %c8_i32_37 : i32
      %78 = vector.broadcast %77 : i32 to vector<8x1xi32>
      %79 = arith.addi %76, %78 : vector<8x1xi32>
      %c28_i32_38 = arith.constant 28 : i32
      %80 = vector.broadcast %c28_i32_38 : i32 to vector<8x1xi32>
      %81 = arith.cmpi slt, %79, %80 : vector<8x1xi32>
      %cst_39 = arith.constant 0.000000e+00 : bf16
      %82 = vector.broadcast %cst_39 : bf16 to vector<8x16xbf16>
      %83 = vector.shape_cast %81 : vector<8x1xi1> to vector<8x1xi1>
      %84 = vector.broadcast %83 : vector<8x1xi1> to vector<8x16xi1>
      %85 = arith.select %84, %7, %82 : vector<8x16xi1>, vector<8x16xbf16>
      %cst_40 = arith.constant 0.000000e+00 : f32
      %cst_41 = arith.constant 0xFF800000 : f32
      %86 = vector.broadcast %cst_40 : f32 to vector<8x1xf32>
      %87 = vector.broadcast %cst_41 : f32 to vector<8x1xf32>
      %88 = arith.select %81, %86, %87 : vector<8x1xi1>, vector<8x1xf32>
      scf.yield %85, %88 : vector<8x16xbf16>, vector<8x1xf32>
    } else {
      %cst_37 = arith.constant 0.000000e+00 : f32
      %76 = vector.broadcast %cst_37 : f32 to vector<8x1xf32>
      scf.yield %7, %76 : vector<8x16xbf16>, vector<8x1xf32>
    }
    %c0_4 = arith.constant 0 : index
    %c0_5 = arith.constant 0 : index
    %14 = vector.load %arg4[%c0_4, %c0_5] : memref<16x32xbf16, #tpu.memory_space<vmem>>, vector<16x32xbf16>
    %cst = arith.constant dense<0.000000e+00> : vector<8x32xf32>
    %15 = tpu.matmul %13#0, %14, %cst {dimension_numbers = #tpu.dot_dimension_numbers<[1], [0], [0], [1], [0, 0, 1, 1], [], []>} : vector<8x16xbf16>, vector<16x32xbf16>, vector<8x32xf32> -> vector<8x32xf32>
    %c0_6 = arith.constant 0 : index
    %c0_7 = arith.constant 0 : index
    %16 = vector.load %arg5[%c0_6, %c0_7] : memref<1x32xf32, #tpu.memory_space<vmem>>, vector<1x32xf32>
    %17 = vector.broadcast %16 : vector<1x32xf32> to vector<8x32xf32>
    %18 = arith.addf %15, %17 : vector<8x32xf32>
    %19 = arith.truncf %18 : vector<8x32xf32> to vector<8x32xbf16>
    %20 = arith.mulf %19, %19 : vector<8x32xbf16>
    %21 = arith.mulf %19, %20 : vector<8x32xbf16>
    %cst_8 = arith.constant 4.467770e-02 : bf16
    %22 = vector.broadcast %cst_8 : bf16 to vector<8x32xbf16>
    %23 = arith.mulf %22, %21 : vector<8x32xbf16>
    %24 = arith.addf %19, %23 : vector<8x32xbf16>
    %cst_9 = arith.constant 7.968750e-01 : bf16
    %25 = vector.broadcast %cst_9 : bf16 to vector<8x32xbf16>
    %26 = arith.mulf %25, %24 : vector<8x32xbf16>
    %27 = math.tanh %26 : vector<8x32xbf16>
    %cst_10 = arith.constant 1.000000e+00 : bf16
    %28 = vector.broadcast %cst_10 : bf16 to vector<8x32xbf16>
    %29 = arith.addf %28, %27 : vector<8x32xbf16>
    %cst_11 = arith.constant 5.000000e-01 : bf16
    %30 = vector.broadcast %cst_11 : bf16 to vector<8x32xbf16>
    %31 = arith.mulf %30, %29 : vector<8x32xbf16>
    %32 = arith.mulf %19, %31 : vector<8x32xbf16>
    %c0_12 = arith.constant 0 : index
    %c0_13 = arith.constant 0 : index
    %33 = vector.load %arg6[%c0_12, %c0_13] : memref<32x32xbf16, #tpu.memory_space<vmem>>, vector<32x32xbf16>
    %cst_14 = arith.constant dense<0.000000e+00> : vector<8x32xf32>
    %34 = tpu.matmul %32, %33, %cst_14 {dimension_numbers = #tpu.dot_dimension_numbers<[1], [0], [0], [1], [0, 0, 1, 1], [], []>} : vector<8x32xbf16>, vector<32x32xbf16>, vector<8x32xf32> -> vector<8x32xf32>
    %c0_15 = arith.constant 0 : index
    %c0_16 = arith.constant 0 : index
    %35 = vector.load %arg7[%c0_15, %c0_16] : memref<1x32xf32, #tpu.memory_space<vmem>>, vector<1x32xf32>
    %36 = vector.broadcast %35 : vector<1x32xf32> to vector<8x32xf32>
    %37 = arith.addf %34, %36 : vector<8x32xf32>
    %38 = arith.truncf %37 : vector<8x32xf32> to vector<8x32xbf16>
    %39 = math.tanh %38 : vector<8x32xbf16>
    %c0_17 = arith.constant 0 : index
    %c0_18 = arith.constant 0 : index
    %40 = vector.load %arg8[%c0_17, %c0_18] : memref<32x128xbf16, #tpu.memory_space<vmem>>, vector<32x128xbf16>
    %cst_19 = arith.constant dense<0.000000e+00> : vector<8x128xf32>
    %41 = tpu.matmul %39, %40, %cst_19 {dimension_numbers = #tpu.dot_dimension_numbers<[1], [0], [0], [1], [0, 0, 1, 1], [], []>} : vector<8x32xbf16>, vector<32x128xbf16>, vector<8x128xf32> -> vector<8x128xf32>
    %42 = vector.extract_strided_slice %41 {offsets = [0, 0], sizes = [8, 1], strides = [1, 1]} : vector<8x128xf32> to vector<8x1xf32>
    %c0_20 = arith.constant 0 : index
    %43 = memref.load %arg9[%c0_20] : memref<1xf32, #tpu.memory_space<smem>>
    %44 = vector.broadcast %43 : f32 to vector<8x1xf32>
    %45 = arith.addf %42, %44 : vector<8x1xf32>
    %46 = arith.addf %45, %13#1 : vector<8x1xf32>
    %c0_21 = arith.constant 0 : index
    %c0_22 = arith.constant 0 : index
    %47 = vector.load %arg13[%c0_21, %c0_22] : memref<1x1xf32, #tpu.memory_space<vmem>>, vector<1x1xf32>
    %cst_23 = arith.constant dense<0xFF800000> : vector<1xf32>
    %48 = vector.multi_reduction <maximumf>, %46, %cst_23 [0] : vector<8x1xf32> to vector<1xf32>
    %49 = vector.shape_cast %48 : vector<1xf32> to vector<1x1xf32>
    %50 = arith.maximumf %47, %49 : vector<1x1xf32>
    %51 = arith.subf %47, %50 : vector<1x1xf32>
    %52 = math.exp %51 : vector<1x1xf32>
    %53 = vector.broadcast %50 : vector<1x1xf32> to vector<8x1xf32>
    %54 = arith.subf %46, %53 : vector<8x1xf32>
    %55 = math.exp %54 : vector<8x1xf32>
    %c0_24 = arith.constant 0 : index
    %c0_25 = arith.constant 0 : index
    %56 = vector.load %arg14[%c0_24, %c0_25] : memref<1x1xf32, #tpu.memory_space<vmem>>, vector<1x1xf32>
    %57 = arith.mulf %52, %56 : vector<1x1xf32>
    %cst_26 = arith.constant dense<0.000000e+00> : vector<1xf32>
    %58 = vector.multi_reduction <add>, %55, %cst_26 [0] : vector<8x1xf32> to vector<1xf32>
    %59 = vector.shape_cast %58 : vector<1xf32> to vector<1x1xf32>
    %60 = arith.addf %57, %59 : vector<1x1xf32>
    %c0_27 = arith.constant 0 : index
    %c0_28 = arith.constant 0 : index
    %61 = vector.load %arg14[%c0_27, %c0_28] : memref<1x1xf32, #tpu.memory_space<vmem>>, vector<1x1xf32>
    tpu.vector_store %arg14[%c0_27, %c0_28], %60 {strides = array<i32>} : memref<1x1xf32, #tpu.memory_space<vmem>>, vector<1x1xf32>,
    %c0_29 = arith.constant 0 : index
    %c0_30 = arith.constant 0 : index
    %62 = vector.load %arg15[%c0_29, %c0_30] : memref<1x32xf32, #tpu.memory_space<vmem>>, vector<1x32xf32>
    %63 = vector.broadcast %52 : vector<1x1xf32> to vector<1x32xf32>
    %64 = arith.mulf %63, %62 : vector<1x32xf32>
    %65 = arith.extf %32 : vector<8x32xbf16> to vector<8x32xf32>
    %66 = vector.broadcast %55 : vector<8x1xf32> to vector<8x32xf32>
    %67 = arith.mulf %66, %65 : vector<8x32xf32>
    %cst_31 = arith.constant dense<0.000000e+00> : vector<32xf32>
    %68 = vector.multi_reduction <add>, %67, %cst_31 [0] : vector<8x32xf32> to vector<32xf32>
    %69 = vector.shape_cast %68 : vector<32xf32> to vector<1x32xf32>
    %70 = arith.addf %64, %69 : vector<1x32xf32>
    %c0_32 = arith.constant 0 : index
    %c0_33 = arith.constant 0 : index
    %71 = vector.load %arg15[%c0_32, %c0_33] : memref<1x32xf32, #tpu.memory_space<vmem>>, vector<1x32xf32>
    tpu.vector_store %arg15[%c0_32, %c0_33], %70 {strides = array<i32>} : memref<1x32xf32, #tpu.memory_space<vmem>>, vector<1x32xf32>,
    %c0_34 = arith.constant 0 : index
    %c0_35 = arith.constant 0 : index
    %72 = vector.load %arg13[%c0_34, %c0_35] : memref<1x1xf32, #tpu.memory_space<vmem>>, vector<1x1xf32>
    tpu.vector_store %arg13[%c0_34, %c0_35], %50 {strides = array<i32>} : memref<1x1xf32, #tpu.memory_space<vmem>>, vector<1x1xf32>,
    %c3_i32 = arith.constant 3 : i32
    %73 = arith.cmpi eq, %arg2, %c3_i32 : i32
    %74 = arith.extui %73 : i1 to i32
    %c0_i32_36 = arith.constant 0 : i32
    %75 = arith.cmpi ne, %74, %c0_i32_36 : i32
    scf.if %75 {
      %c0_37 = arith.constant 0 : index
      %c0_38 = arith.constant 0 : index
      %76 = vector.load %arg13[%c0_37, %c0_38] : memref<1x1xf32, #tpu.memory_space<vmem>>, vector<1x1xf32>
      %c0_39 = arith.constant 0 : index
      %c0_40 = arith.constant 0 : index
      %c0_41 = arith.constant 0 : index
      %c0_42 = arith.constant 0 : index
      %77 = vector.load %arg10[%c0_39, %c0_40, %c0_41, %c0_42] : memref<1x1x1x1xf32, #tpu.memory_space<vmem>>, vector<1x1x1x1xf32>
      %78 = vector.shape_cast %77 : vector<1x1x1x1xf32> to vector<1x1xf32>
      %79 = vector.shape_cast %76 : vector<1x1xf32> to vector<1x1x1x1xf32>
      tpu.vector_store %arg10[%c0_39, %c0_40, %c0_41, %c0_42], %79 {strides = array<i32>} : memref<1x1x1x1xf32, #tpu.memory_space<vmem>>, vector<1x1x1x1xf32>,
      %c0_43 = arith.constant 0 : index
      %c0_44 = arith.constant 0 : index
      %80 = vector.load %arg14[%c0_43, %c0_44] : memref<1x1xf32, #tpu.memory_space<vmem>>, vector<1x1xf32>
      %c0_45 = arith.constant 0 : index
      %c0_46 = arith.constant 0 : index
      %c0_47 = arith.constant 0 : index
      %c0_48 = arith.constant 0 : index
      %81 = vector.load %arg11[%c0_45, %c0_46, %c0_47, %c0_48] : memref<1x1x1x1xf32, #tpu.memory_space<vmem>>, vector<1x1x1x1xf32>
      %82 = vector.shape_cast %81 : vector<1x1x1x1xf32> to vector<1x1xf32>
      %83 = vector.shape_cast %80 : vector<1x1xf32> to vector<1x1x1x1xf32>
      tpu.vector_store %arg11[%c0_45, %c0_46, %c0_47, %c0_48], %83 {strides = array<i32>} : memref<1x1x1x1xf32, #tpu.memory_space<vmem>>, vector<1x1x1x1xf32>,
      %c0_49 = arith.constant 0 : index
      %c0_50 = arith.constant 0 : index
      %84 = vector.load %arg15[%c0_49, %c0_50] : memref<1x32xf32, #tpu.memory_space<vmem>>, vector<1x32xf32>
      %c0_51 = arith.constant 0 : index
      %c0_52 = arith.constant 0 : index
      %c0_53 = arith.constant 0 : index
      %c0_54 = arith.constant 0 : index
      %85 = vector.load %arg12[%c0_51, %c0_52, %c0_53, %c0_54] : memref<1x1x1x32xf32, #tpu.memory_space<vmem>>, vector<1x1x1x32xf32>
      %86 = vector.shape_cast %85 : vector<1x1x1x32xf32> to vector<1x32xf32>
      %87 = vector.shape_cast %84 : vector<1x32xf32> to vector<1x1x1x32xf32>
      tpu.vector_store %arg12[%c0_51, %c0_52, %c0_53, %c0_54], %87 {strides = array<i32>} : memref<1x1x1x32xf32, #tpu.memory_space<vmem>>, vector<1x1x1x32xf32>,
    } else {
    }
    return
  }
  func.func @transform_0(%arg0: i32, %arg1: i32, %arg2: i32) -> (i32, i32, i32) {
    %c4_i32 = arith.constant 4 : i32
    %0 = arith.muli %arg1, %c4_i32 : i32
    %1 = arith.addi %0, %arg2 : i32
    %c3_i32 = arith.constant 3 : i32
    %2 = arith.minsi %1, %c3_i32 : i32
    %c0_i32 = arith.constant 0 : i32
    %c0_i32_0 = arith.constant 0 : i32
    return %arg0, %2, %c0_i32 : i32, i32, i32
  }
  func.func @transform_1(%arg0: i32, %arg1: i32, %arg2: i32) -> (i32, i32) {
    %c0_i32 = arith.constant 0 : i32
    %c0_i32_0 = arith.constant 0 : i32
    %c0_i32_1 = arith.constant 0 : i32
    return %c0_i32, %c0_i32_0 : i32, i32
  }
  func.func @transform_2(%arg0: i32, %arg1: i32, %arg2: i32) -> (i32, i32) {
    %c0_i32 = arith.constant 0 : i32
    %c0_i32_0 = arith.constant 0 : i32
    %c0_i32_1 = arith.constant 0 : i32
    return %c0_i32, %c0_i32_0 : i32, i32
  }
  func.func @transform_3(%arg0: i32, %arg1: i32, %arg2: i32) -> (i32, i32) {
    %c0_i32 = arith.constant 0 : i32
    %c0_i32_0 = arith.constant 0 : i32
    %c0_i32_1 = arith.constant 0 : i32
    return %c0_i32, %c0_i32_0 : i32, i32
  }
  func.func @transform_4(%arg0: i32, %arg1: i32, %arg2: i32) -> (i32, i32) {
    %c0_i32 = arith.constant 0 : i32
    %c0_i32_0 = arith.constant 0 : i32
    %c0_i32_1 = arith.constant 0 : i32
    return %c0_i32, %c0_i32_0 : i32, i32
  }
  func.func @transform_5(%arg0: i32, %arg1: i32, %arg2: i32) -> (i32, i32) {
    %c0_i32 = arith.constant 0 : i32
    %c0_i32_0 = arith.constant 0 : i32
    %c0_i32_1 = arith.constant 0 : i32
    return %c0_i32, %c0_i32_0 : i32, i32
  }
  func.func @transform_6(%arg0: i32, %arg1: i32, %arg2: i32) -> i32 {
    %c0_i32 = arith.constant 0 : i32
    %c0_i32_0 = arith.constant 0 : i32
    return %c0_i32 : i32
  }
  func.func @transform_7(%arg0: i32, %arg1: i32, %arg2: i32) -> (i32, i32, i32, i32) {
    %c0_i32 = arith.constant 0 : i32
    %c0_i32_0 = arith.constant 0 : i32
    %c0_i32_1 = arith.constant 0 : i32
    return %arg0, %arg1, %c0_i32, %c0_i32_0 : i32, i32, i32, i32
  }
  func.func @transform_8(%arg0: i32, %arg1: i32, %arg2: i32) -> (i32, i32, i32, i32) {
    %c0_i32 = arith.constant 0 : i32
    %c0_i32_0 = arith.constant 0 : i32
    %c0_i32_1 = arith.constant 0 : i32
    return %arg0, %arg1, %c0_i32, %c0_i32_0 : i32, i32, i32, i32
  }
  func.func @transform_9(%arg0: i32, %arg1: i32, %arg2: i32) -> (i32, i32, i32, i32) {
    %c0_i32 = arith.constant 0 : i32
    %c0_i32_0 = arith.constant 0 : i32
    %c0_i32_1 = arith.constant 0 : i32
    return %arg0, %arg1, %c0_i32, %c0_i32_0 : i32, i32, i32, i32
  }
}

</mosaic_0001>

<bundles_post_ra>
// kernel: tpu_custom_call.1
= control target key start
LH: loop header
LB: loop body
LE: loop exit
PB: predicated region body
PF: predicated region fallthrough
CT: control target
= control target key end

     0   :  { %s1447_s0 = inlined_call_operand.vmem [shape: f32[2,28,16], index: 0, kind: input, shape index: {}]   ;;  %s1448_s1 = inlined_call_operand.vmem [shape: bf16[16,32], index: 1, kind: input, shape index: {}]   ;;  %s1449_s2 = inlined_call_operand.vmem [shape: f32[1,32], index: 2, kind: input, shape index: {}]   ;;  %s1450_s3 = inlined_call_operand.vmem [shape: bf16[32,32], index: 3, kind: input, shape index: {}]   ;;  %s1451_s4 = inlined_call_operand.vmem [shape: f32[1,32], index: 4, kind: input, shape index: {}]   ;;  %s1452_s5 = inlined_call_operand.vmem [shape: bf16[32,128], index: 5, kind: input, shape index: {}]   ;;  %s1453_s6 = inlined_call_operand.<no memory space> [shape: f32[1], index: 6, kind: input, shape index: {}]   ;;  %s1454_s7 = inlined_call_operand.vmem [shape: f32[2,1,1,1], index: 7, kind: output, shape index: {0}]   ;;  %s1455_s8 = inlined_call_operand.vmem [shape: f32[2,1,1,1], index: 8, kind: output, shape index: {1}]   ;;  %s1456_s9 = inlined_call_operand.hbm [shape: f32[2,1,1,32], index: 9, kind: output, shape index: {2}]  }
   0x1   :  { %15 = sst [smem:[#allocation5]] %s1453_s6 }
   0x2   :  { %16 = vsyncpa [#allocation7], 0 }
   0x3   :  { %18 = vsyncpa [#allocation7 + $0x1], 0  ;;  %s1227_s11 = smov 0   ;;  %s1229_s12 = smov 0  }
   0x4   :  { %s1231_s13 = smov 0   ;;  %s1233_s14 = smov 0  }
   0x5   :  { %s1235_s15 = smov 0   ;;  %s1237_s16 = smov 0  }
   0x6   :  { %s1239_s17 = smov 0   ;;  %s1241_s18 = smov 0  }
   0x7 LB: > { %1462 = sst [smem:[#allocation9_spill]] %s1145_s13  ;;  %s900_s6 = sadd.s32 4294967295, %s1165_s18   ;;  %s1165_s18 = sphi %s1241_s18, %s24_s18   ;;  %s1161_s17 = sphi %s1239_s17, %s1483_s17   ;;  %s1157_s16 = sphi %s1237_s16, %s1482_s16   ;;  %s1153_s15 = sphi %s1235_s15, %s1481_s15   ;;  %s1149_s14 = sphi %s1233_s14, %s1480_s14   ;;  %s1145_s13 = sphi %s1231_s13, %s1479_s13   ;;  %s1141_s12 = sphi %s1229_s12, %s1485_s12   ;;  %s1137_s11 = sphi %s1227_s11, %s1484_s11  }
   0x8   : > { %1463 = sst [smem:[#allocation10_spill]] %s1157_s16  ;;  %s901_s19 = sadd.s32 4294967294, %s1165_s18  }
   0x9   : > { %1464 = sst [smem:[#allocation11_spill]] %s1161_s17  ;;  %s36_s20 = sadd.s32 1, %s1157_s16 }
   0xa   : > { %p37_p0 = scmp.ge.s32.totalorder %s36_s20, 4  ;;  %s43_s21 = sadd.s32 1, %s1161_s17 }
   0xb   : > { %p280_p1 = scmp.ne.s32.totalorder %s1145_s13, %s1141_s12  ;;  %p281_p2 = scmp.eq.s32.totalorder %s900_s6, 7 }
   0xc   : > { %s1487_s20 = smov (%p37_p0, %s36_s20), 0  ;;  %s1489_s21 = smov (!%p37_p0, %s43_s21), %s1161_s17 }
   0xd   : > { %1465 = sst [smem:[#allocation12_spill]] %s1487_s20  ;;  %p1276_p3 = por %p281_p2, %p280_p1 }
   0xe   : > { %p286_p4 = scmp.ne.s32.totalorder %s1141_s12, %s1137_s11  ;;  %p45_p5 = scmp.ge.s32.totalorder %s1489_s21, 2 }
   0xf   : > { %p287_p6 = scmp.eq.s32.totalorder %s901_s19, 7  ;;  %p904_p7 = scmp.ge.s32.totalorder %s1165_s18, 1 }
  0x10   : > { %p342_p8 = scmp.lt.s32.totalorder %s1165_s18, 9  ;;  %s1491_s21 = smov (%p45_p5, %s1489_s21), 0 }
  0x11   : > { %1467 = sst [smem:[#allocation13_spill]] %s1491_s21  ;;  %p1286_p9 = por %p287_p6, %p286_p4 }
  0x12   : > { %p343_p10 = pnand %p904_p7, %p342_p8  ;;  %s265_s24 = ssub.s32 %s1161_s17, %s1491_s21 }
  0x13   : > { %s1468_s23 = scalar_select %p1286_p9, 1, 0 }
  0x14   : > { %s270_s25 = sadd.s32 1, %s1145_s13  ;;  %p268_p11 = scmp.eq.s32.totalorder %s265_s24, 0 }
  0x15   : > { %1469 = sst [smem:[#allocation14_spill]] %s1468_s23  ;;  %346 = sbr.rel (%p343_p10) target bundleno = 947 (0x3b3), region = 48 }
  0x16   : > { %s1294_s26 = scalar_select %p268_p11, %s1145_s13, %s270_s25  }
  0x17   : > { %p398_p12 = scmp.lt.s32.totalorder (!%p343_p10), %s1149_s14, 3  ;;  %p400_p13 = scmp.lt.s32.totalorder (!%p343_p10), %s1153_s15, 1 }
  0x18   : > { %1470 = sst [smem:[#allocation15_spill]] %s1294_s26  ;;  %s1471_s13 = sand.u32 (!%p343_p10), 1, %s1141_s12  }
  0x19   : > { %s1317_s23 = scalar_lea.vmem (!%p343_p10), [#allocation6], %s1471_s13  ;;  %p910_p0 = scmp.ne.s32.totalorder (!%p343_p10), %s1149_s14, 0 }
  0x1c   : > { %s399_s28 = scalar_select %p398_p12, %s1149_s14, 3 }
  0x1d   : > { %s1301_s29 = scalar_select %p400_p13, %s1153_s15, 1 }
  0x1e   : > { %s1493_s28 = smov (!%p398_p12, %s399_s28), 3  ;;  %434 = sbr.rel (%p910_p0) target bundleno = 37 (0x25), region = 52 }
  0x1f   : > { %s908_s30 = sshll.u32 %s1301_s29, 2  ;;  %s417_s19 = scalar_lea.vmem %s1454_s7, %s1301_s29  ;;  %vm435_vm0 = vcmask (!%p910_p0), 0   ;;  %vm438_vm1 = vcmask (!%p910_p0), 253952   ;;  %v1167_v0 = vmov (!%p910_p0), -inf   ;;  %v1168_v1 = vmov (!%p910_p0), 0.0  }
  0x20   : > { %s405_s24 = sadd.s32 %s908_s30, %s1493_s28  ;;  %s423_s20 = scalar_lea.vmem %s1455_s8, %s1301_s29  ;;  %436 = vst.msk [vmem:[#allocation2] sm:$0x1] (!%p910_p0), %vm435_vm0, %v1167_v0  ;;  %437 = vst.msk [vmem:[#allocation3] sm:$0x1] (!%p910_p0), %vm435_vm0, %v1168_v1 }
  0x21   : > { %s909_s27 = sshll.u32 %s405_s24, 3  ;;  %439 = vst.msk [vmem:[#allocation4] sm:$0x1] (!%p910_p0), %vm438_vm1, %v1168_v1 }
  0x22   : > { %s407_s26 = scalar_lea.vmem %s1447_s0, %s909_s27 }
  0x25 PF: > { %v1058_v2 = vld [vmem:[%s1448_s1] sm:$0xff]   ;;  %v448_v3 = vlaneseq  ;;  %v1169_v4 = vmov 0.0   ;;  %s928_s13 = sshll.u32 %s1149_s14, 3  ;;  %vm1170_vm2 = vmmov 0   ;;  %vm481_vm6 = vcmask 130048   ;;  %v1060_v18 = vld [vmem:[%s1450_s3 + $0x8] sm:$0xff]  }
  0x26   : > { %938 = vmatprep.subr.bf16.mxu0 %v1169_v4  ;;  %v440_v5 = vld [vmem:[%s407_s26] sm:$0xff]  ;;  %944 = vmatprep.subr.bf16.mxu1 %v1169_v4  ;;  %s929_s16 = sadd.s32 8, %s928_s13  ;;  %v451_v7 = vstv %s928_s13  ;;  %vm558_vm8 = vcmask 261120   ;;  %v1062_v36 = vld [vmem:[%s1452_s5 + $0x8] sm:$0xff]   ;;  %v1171_v45 = vmov 0   ;;  %s663_s27 = sld [smem:[#allocation5]] }
  0x27   : > { %939 = vmatpush3.bf16.msra.mxu0 %v1058_v2  ;;  %940 = vmatprep.mubr.msk.bf16.mxu0 %vm1170_vm2, %v1169_v4  ;;  %v1325_v6 = vshrl.u32 %v448_v3, 7  ;;  %p444_p1 = scmp.gt.s32.totalorder %s929_s16, 28  ;;  %p912_p2 = scmp.le.s32.totalorder %s929_s16, 28  ;;  %v441_v8 = vpack.c.bf16 %v440_v5, %v440_v5  ;;  %v1059_v17 = vld [vmem:[%s1450_s3] sm:$0xff]   ;;  %v1172_v46 = vmov -inf   ;;  %vm668_vm9 = vcmask 7168  }
  0x28   : > { %948 = vmatprep.mubr.msk.bf16.mxu1 %vm1170_vm2, %v1169_v4  ;;  %952 = vmatprep.subr.bf16.mxu0 %v1169_v4  ;;  %v914_v19 = vld [vmem:[%s1449_s2] ss:$0 sm:$0xff]  ;;  %vm699_vm10 = vcmask 0   ;;  %v689_v15 = vld [vmem:[#allocation3] sm:$0x1]  ;;  %vm727_vm11 = vcmask 253952  }
  0x29   : > { %v452_v9 = vadd.s32 %v451_v7, %v1325_v6  ;;  %s961_s17 = scalar_select %p444_p1, 1, 0  ;;  %945 = vmatpush3.bf16.msra.mxu1 %v1059_v17  ;;  %v1061_v35 = vld [vmem:[%s1452_s5] sm:$0xff]   ;;  %1057 = vset.pattern.permute.xlu0 %v1171_v45  ;;  %v683_v1 = vsub.s32 0, %v1325_v6 }
  0x2a   : > { %s970_s26 = scalar_select %p912_p2, 1, 0  ;;  %946 = vmatprep.subr.bf16.mxu1 %v1169_v4  ;;  %v917_v37 = vld [vmem:[%s1451_s4] ss:$0 sm:$0xff] }
  0x2b   : > { %vm453_vm3 = vcmp.lt.s32.totalorder %v452_v9, 28  ;;  %v962_v10 = vstv %s961_s17  ;;  %v667_v63 = vld [vmem:[#allocation2] sm:$0x1]  ;;  %p924_p4 = scmp.ne.s32.totalorder %s1149_s14, 3 }
  0x2c   : > { %vm456_vm4 = vmpackc.low %vm453_vm3, %vm453_vm3  ;;  %vm1331_vm5 = vcmp.ne.s32.totalorder %v962_v10, 0  ;;  %v971_v13 = vstv %s970_s26  ;;  %v458_v47 = vsel %vm453_vm3, 0.0, %v1172_v46  ;;  %v664_v49 = vstv %s663_s27 }
  0x2d   : > { %v457_v11 = vsel %vm456_vm4, %v441_v8, 0  ;;  %vm1337_vm7 = vcmp.ne.s32.totalorder %v971_v13, 0  ;;  %947 = vmatpush3.bf16.msra.mxu1 %v1060_v18  ;;  %v968_v48 = vsel %vm1331_vm5, %v458_v47, 0 }
  0x2e   : > { %v964_v14 = vsel %vm1331_vm5, %v457_v11, 0  ;;  %v977_v50 = vsel %vm1337_vm7, 0.0, %v968_v48 }
  0x2f   : > { %v973_v16 = vsel %vm1337_vm7, %v441_v8, %v964_v14 }
  0x30   : > { %941 = vmatmul.mubr.msk.bf16.vlgmr.msra.gmra.mrb[0].mxu0 %vm481_vm6, %v973_v16 }
  0x31   : > { %956 = vmatprep.mubr.msk.bf16.mxu0 %vm1170_vm2, %v1169_v4  ;;  %953 = vmatpush3.bf16.msra.mxu0 %v1061_v35 }
  0x32   : > { %954 = vmatprep.subr.bf16.mxu0 %v1169_v4 }
  0x35   : > { %955 = vmatpush3.bf16.msra.mxu0 %v1062_v36 }
 0x103   : > { %v519_v20 = vpop.f32.mrb[0].mxu0 }
 0x104   : > { %v520_v21 = vadd.f32 %v914_v19, %v519_v20  ;;  %v942_v22 = vpop.f32.mrb[1].mxu0 }
 0x105   : > { %v522_v23 = vpop.f32.mrb[2].mxu0 }
 0x106   : > { %v525_v24 = vpack.c.bf16 %v520_v21, %v520_v21  ;;  %v943_v25 = vpop.f32.mrb[3].mxu0 }
 0x108   : > { %v526_v26 = vmul.bf16 %v525_v24, %v525_v24 }
 0x10a   : > { %v527_v27 = vmul.bf16 %v526_v26, %v525_v24 }
 0x10c   : > { %v528_v28 = vmul.bf16 1027030327, %v527_v27 }
 0x10e   : > { %v529_v29 = vadd.bf16 %v528_v28, %v525_v24 }
 0x110   : > { %v530_v30 = vmul.bf16 1061961548, %v529_v29 }
 0x112   : > { %1063 = vtanh.bf16 %v530_v30  ;;  %v701_v30 = vld [vmem:[#allocation4] sm:$0x1] }
 0x11d   : > { %v1064_v31 = vpop.eup %1063 }
 0x11e   : > { %v532_v32 = vadd.bf16 1065369472, %v1064_v31 }
 0x120   : > { %v533_v33 = vmul.bf16 1056980736, %v532_v32 }
 0x122   : > { %v1353_v34 = vmul.bf16 %v533_v33, %v525_v24 }
 0x124   : > { %949 = vmatmul.mubr.msk.bf16.vlgmr.msra.gmra.mrb[0].mxu1 %vm558_vm8, %v1353_v34  ;;  %v712_v20 = vunpack.c.l.bf16 %v1353_v34 }
 0x1f7   : > { %v596_v38 = vpop.f32.mrb[0].mxu1 }
 0x1f8   : > { %v597_v39 = vadd.f32 %v917_v37, %v596_v38  ;;  %v950_v40 = vpop.f32.mrb[1].mxu1 }
 0x1f9   : > { %v599_v41 = vpop.f32.mrb[2].mxu1 }
 0x1fa   : > { %v602_v42 = vpack.c.bf16 %v597_v39, %v597_v39  ;;  %v951_v43 = vpop.f32.mrb[3].mxu1 }
 0x1fc   : > { %1065 = vtanh.bf16 %v602_v42 }
 0x207   : > { %v1066_v44 = vpop.eup %1065 }
 0x208   : > { %957 = vmatmul.mubr.msk.bf16.vlgmr.msra.gmra.mrb[4].mxu0 %vm558_vm8, %v1066_v44 }
 0x2db   : > { %v657_v51 = vpop.f32.mrb[4].mxu0 }
 0x2dc   : > { %v665_v52 = vadd.f32 %v664_v49, %v657_v51  ;;  %v958_v53 = vpop.f32.mrb[5].mxu0 }
 0x2dd   : > { %v660_v54 = vpop.f32.mrb[6].mxu0 }
 0x2de   : > { %v666_v55 = vadd.f32 %v977_v50, %v665_v52  ;;  %v959_v56 = vpop.f32.mrb[7].mxu0 }
 0x2e0   : > { %v669_v57 = vsel %vm668_vm9, %v666_v55, -inf }
 0x2e1   : > { %v670_v58 = vrot.slane %v669_v57, 4 }
 0x2e3   : > { %v671_v59 = vmax.f32 %v669_v57, %v670_v58 }
 0x2e5   : > { %v672_v60 = vrot.slane %v671_v59, 2 }
 0x2e7   : > { %v673_v61 = vmax.f32 %v671_v59, %v672_v60 }
 0x2e9   : > { %v674_v62 = vrot.slane %v673_v61, 1 }
 0x2eb   : > { %v675_v0 = vmax.f32 %v673_v61, %v674_v62 }
 0x2ed   : > { %v676_v2 = vmax.f32 %v667_v63, %v675_v0 }
 0x2ef   : > { %v684_v3 = vrot.slane %v676_v2, %v683_v1  ;;  %729 = vst.msk [vmem:[#allocation2] sm:$0x1] %vm699_vm10, %v676_v2  ;;  %v677_v4 = vsub.f32 %v667_v63, %v676_v2 }
 0x2f1   : > { %v686_v5 = vsub.f32 %v666_v55, %v684_v3  ;;  %v678_v8 = vmul.f32 1.442695, %v677_v4 }
 0x2f3   : > { %v687_v7 = vmul.f32 1.442695, %v686_v5 }
 0x2f5   : > { %1067 = vpow2.f32 %v687_v7 }
 0x2f6   : > { %1069 = vpow2.f32 %v678_v8  ;;  %v734_v34 = vld [vmem:[#allocation2] sm:$0x1] (!%p924_p4) }
 0x2f7   : > { %735 = vst.msk [vmem:[%s417_s19] sm:$0x1] (!%p924_p4), %vm699_vm10, %v734_v34 }
 0x2ff   : > { %v1068_v9 = vpop.eup %1067 }
 0x300   : > { %v691_v10 = vsel %vm668_vm9, %v1068_v9, 0.0  ;;  %715 = vperm.xlu0 %1057, %v1068_v9   ;;  %v1070_v12 = vpop.eup %1069 }
 0x301   : > { %v692_v11 = vrot.slane %v691_v10, 4  ;;  %v690_v17 = vmul.f32 %v1070_v12, %v689_v15 }
 0x303   : > { %v693_v13 = vadd.f32 %v692_v11, %v691_v10 }
 0x304   : > { %704 = vperm.xlu0 %1057, %v1070_v12  }
 0x305   : > { %v694_v6 = vrot.slane %v693_v13, 2 }
 0x307   : > { %v695_v14 = vadd.f32 %v694_v6, %v693_v13 }
 0x309   : > { %v696_v16 = vrot.slane %v695_v14, 1 }
 0x30b   : > { %v697_v18 = vadd.f32 %v696_v16, %v695_v14 }
 0x30d   : > { %v698_v19 = vadd.f32 %v697_v18, %v690_v17 }
 0x30f   : > { %700 = vst.msk [vmem:[#allocation3] sm:$0x1] %vm699_vm10, %v698_v19 }
 0x316   : > { %v736_v36 = vld [vmem:[#allocation3] sm:$0x1] (!%p924_p4) }
 0x317   : > { %737 = vst.msk [vmem:[%s423_s20] sm:$0x1] (!%p924_p4), %vm699_vm10, %v736_v36 }
 0x37f   : > { %v716_v21 = vpop.permute.xlu0 %715 }
 0x380   : > { %v718_v22 = vmul.f32 %v716_v21, %v712_v20 }
 0x382   : > { %v719_v23 = vsel %vm558_vm8, %v718_v22, 0.0 }
 0x383   : > { %v720_v24 = vrot.slane %v719_v23, 4  ;;  %v705_v26 = vpop.permute.xlu0 %704 }
 0x384   : > { %v710_v29 = vrot.slane %v705_v26, %v683_v1 }
 0x385   : > { %v721_v25 = vadd.f32 %v720_v24, %v719_v23 }
 0x386   : > { %v711_v33 = vmul.f32 %v710_v29, %v701_v30 }
 0x387   : > { %v722_v27 = vrot.slane %v721_v25, 2 }
 0x389   : > { %v723_v28 = vadd.f32 %v722_v27, %v721_v25 }
 0x38b   : > { %v724_v31 = vrot.slane %v723_v28, 1  ;;  %733 = sbr.rel (%p924_p4) target bundleno = 922 (0x39a), region = 64 }
 0x38d   : > { %v725_v32 = vadd.f32 %v724_v31, %v723_v28 }
 0x38f   : > { %v726_v35 = vadd.f32 %v725_v32, %v711_v33 }
 0x391   : > { %728 = vst.msk [vmem:[#allocation4] sm:$0x1] %vm727_vm11, %v726_v35 }
 0x398   : > { %v738_v37 = vld [vmem:[#allocation4] sm:$0x1] }
 0x399   : > { %739 = vst.msk [vmem:[%s1317_s23] sm:$0x1] %vm727_vm11, %v738_v37 }
 0x39a PF: > { %s925_s14 = sshll.u32 %s1153_s15, 4  ;;  %s772_s13 = sshll.u32 %s1317_s23, 4  ;;  %s773_s13 = int_to_ptr.vmem [resolvable:$true] %s772_s13 }
 0x39b   : > { %s1397_s28 = scalar_lea.hbm %s1456_s9, %s925_s14  ;;  %s1476_s19 = sand.u32 1, %s1141_s12  }
 0x39c   : > { %s753_s16 = scalar_lea.sflag [#allocation7], %s1476_s19  ;;  %s1071_s17 = scalar_lea.vmem %s773_s13, 16 }
 0x39d   : > { %p1072_p5 = scmp.ne.s32.totalorder %s773_s13, %s1071_s17  ;;  %s1173_s20 = smov [#allocation6]  }
 0x39e   : > { %s1075_s29 = sshll.u32 %s1173_s20, 4  ;;  %s1076_s29 = int_to_ptr.vmem [resolvable:$false] %s1075_s29 }
 0x39f   : > { %p1073_p6 = pnand %p1072_p5, %p1276_p3  ;;  %s1077_s26 = scalar_lea.vmem %s1076_s29, 32 }
 0x3a0   : > { %p1078_p8 = scmp.lt.s32.totalorder %s773_s13, %s1076_s29  ;;  %p1079_p10 = scmp.lt.s32.totalorder %s1077_s26, %s1071_s17 }
 0x3a1   : > { %p1074_p7 = pneg %p1073_p6 }
 0x3a2   : > { %p1080_p11 = por %p1079_p10, %p1078_p8 }
 0x3a4   : > { %p1081_p12 = pnand %p1080_p11, %p1074_p7 }
 0x3a6   : > { %1084 = shalt.err (!%p1081_p12)
}
 0x3a7   : > { %s1085_s15 = scalar_lea.hbm %s1397_s28, 16  ;;  %s1089_s30 = scalar_lea.hbm %s1456_s9, 32 }
 0x3a8   : > { %p1086_p13 = scmp.ne.s32.totalorder %s1397_s28, %s1085_s15  ;;  %p1090_p2 = scmp.lt.u32.totalorder %s1397_s28, %s1456_s9 }
 0x3a9   : > { %p1091_p4 = scmp.lt.u32.totalorder %s1089_s30, %s1085_s15  ;;  %p1093_p6 = scmp.lt.u32.totalorder %s1085_s15, %s1397_s28 }
 0x3aa   : > { %p1087_p0 = pnand %p1086_p13, %p1276_p3 }
 0x3ab   : > { %p1092_p5 = por %p1091_p4, %p1090_p2 }
 0x3ac   : > { %p1088_p1 = pneg %p1087_p0 }
 0x3ad   : > { %p1094_p7 = por %p1093_p6, %p1092_p5 }
 0x3af   : > { %p1095_p8 = pnand %p1094_p7, %p1088_p1 }
 0x3b1   : > { %1098 = shalt.err (!%p1095_p8)
}
 0x3b2   : > { %978 = dma.vmem_to_hbm [thread:$0]  (%p1276_p3), %s773_s13, 16, %s1397_s28, %s753_s16  }
 0x3b3 PF: > { %p986_p10 = scmp.ge.s32.totalorder %s1165_s18, 2  ;;  %s802_s14 = sand.u32 1, %s1137_s11  }
 0x3b4   : > { %s803_s25 = scalar_lea.sflag [#allocation7], %s802_s14 }
 0x3b5   : > { %p981_p11 = pnand %p986_p10, %p1286_p9 }
 0x3b7   : > { %1132 = dma.done.wait (!%p981_p11), %s803_s25, 16  }
 0x3b8   : > { %1134 = vsyncadd (!%p981_p11), %s803_s25, 4294967280  ;;  %s24_s18 = sadd.s32 1, %s1165_s18   ;;  %s1478_s21 = sld [smem:[#allocation9_spill]] }
 0x3b9   : > { %p21_p12 = scmp.ge.s32.totalorder %s24_s18, 10   ;;  %s1479_s13 = sld [smem:[#allocation15_spill]] }
 0x3ba   : > { %s1480_s14 = sld [smem:[#allocation10_spill]]  ;;  %s1481_s15 = sld [smem:[#allocation11_spill]] }
 0x3bb   : > { %s1482_s16 = sld [smem:[#allocation12_spill]]  ;;  %s1483_s17 = sld [smem:[#allocation13_spill]] }
 0x3bc   : > { %s1484_s11 = smov %s1141_s12  ;;  %23 = sbr.rel (!%p21_p12) target bundleno = 7 (0x7), region = 123 }
 0x3be   : > { %s1485_s12 = smov %s1478_s21 }
 0x3c3   :  { %807 = vsyncpa [#allocation7], 1 }
 0x3c4   :  { %809 = vsyncpa [#allocation7 + $0x1], 1 }

</bundles_post_ra>
